<compile_context>
chip_gen: v7x
topology: tpu7x:2x2x1
jax: 0.10.0
libtpu: 0.0.40
codegen_flags: <defaults>
</compile_context>

<pallas_src>
import functools

import jax
import jax.numpy as jnp
import numpy as np
from jax import lax
from jax.experimental import pallas as pl
from jax.experimental.pallas import tpu as pltpu


def _bottleneck_kernel(x_ref, st1_ref, w1_ref, b12_ref, w2_ref, mask_ref,
                       w3_ref, wid_ref, bout_ref, o_ref, *, width, hw_block):
    """One lane-block (B_TILE images) per grid step.  x_ref block: (Cin, L) f32."""
    x = x_ref[...]                                              # (Cin, L) f32

    # --- BN1 (eval scale/shift) + ReLU + conv1 (BN2 folded in) ----------------
    a0 = jnp.maximum(x * st1_ref[:, 0:1] + st1_ref[:, 1:2], 0.0)
    y1 = jnp.dot(w1_ref[...], a0.astype(jnp.bfloat16),
                 preferred_element_type=jnp.float32) + b12_ref[:, 0:1]
    a1 = jnp.maximum(y1, 0.0)                                   # (Ppad, L) f32

    # --- 3x3 conv (stride 1, pad 1) as ONE im2col matmul, K = 9*Ppad ----------
    # Taps are XLU lane rotations of a1; the (9, L) 0/1 boundary mask (broadcast
    # across sublanes, applied as a multiply) zeroes out-of-image pixels, roll
    # wrap-around, and cross-image bleed along the folded lane axis.
    # (v6e/v7x variant: cast a1 + mask to bf16 before masking to halve VPU
    #  volume; kept f32 here since v5e has no bf16 VALU.)
    taps = []
    k = 0
    for oy in (-1, 0, 1):
        for ox in (-1, 0, 1):
            off = oy * width + ox
            if off == 0:
                taps.append(a1)                                 # center tap: always valid
            else:
                t = pltpu.roll(a1, shift=(-off) % hw_block, axis=1)
                taps.append(t * mask_ref[k:k + 1, :])           # sublane-broadcast mask
            k += 1
    im2col = jnp.concatenate(taps, axis=0).astype(jnp.bfloat16)  # (9*Ppad, L)
    y2 = jnp.dot(w2_ref[...], im2col,
                 preferred_element_type=jnp.float32) + b12_ref[:, 1:2]
    a2 = jnp.maximum(y2, 0.0)                                   # (Ppad, L) f32

    # --- conv3 + 1x1 identity conv: two accumulating lane-dense dots ----------
    y3 = jnp.dot(w3_ref[...], a2.astype(jnp.bfloat16),
                 preferred_element_type=jnp.float32)
    yid = jnp.dot(wid_ref[...], x, preferred_element_type=jnp.float32)  # f32 skip path
    o_ref[...] = y3 + yid + bout_ref[...]


@functools.partial(jax.jit, static_argnames=("planes", "expansion"))
def bottleneck_forward(x_nchw, params, *, planes, expansion):
    N, Cin, H, W = x_nchw.shape
    P = planes
    Cout = planes * expansion
    HW = H * W
    Ppad = ((P + 7) // 8) * 8                 # sublane-aligned inner width

    # Batch folded into lanes; keep >= 2 grid steps when possible (v7x has 2 TCs).
    n_steps = 2 if (N >= 2 and N % 2 == 0) else 1
    B_TILE = N // n_steps
    L = B_TILE * HW                           # lane extent per grid step
    assert Cin % 8 == 0 and Cout % 8 == 0 and L % 128 == 0, "toy-shape assumptions"

    # Wrapper-side layout: NCHW -> channels-major (Cin, N*HW).
    x2d = (x_nchw.astype(jnp.float32)
           .transpose(1, 0, 2, 3).reshape(Cin, N * HW))

    (s1, t1, w1, b1, s2, t2, w2, b2, s3, t3, w3, b3, wid, bid) = params

    # Host-side algebra: fold BN2 into conv1 and BN3 into conv2 (pure refactor).
    w1s = w1 * s2[None, :]                            # (Cin, P)
    b1f = b1 * s2 + t2                                # (P,)
    w2s = w2 * s3[None, None, :]                      # (9, P, P)  [tap, cin, cout]
    b2f = b2 * s3 + t3                                # (P,)

    # Transposed (channels-major), zero-padded (P -> Ppad) MXU weights.
    w1t = (jnp.zeros((Ppad, Cin), jnp.float32)
           .at[:P, :].set(w1s.T)).astype(jnp.bfloat16)                 # (Ppad, Cin)
    w2tp = jnp.pad(jnp.transpose(w2s, (2, 0, 1)),
                   ((0, 0), (0, 0), (0, Ppad - P)))                    # (P, 9, Ppad)
    w2t = (jnp.zeros((Ppad, 9 * Ppad), jnp.float32)
           .at[:P, :].set(w2tp.reshape(P, 9 * Ppad))).astype(jnp.bfloat16)
    w3t = (jnp.zeros((Cout, Ppad), jnp.float32)
           .at[:, :P].set(w3.T)).astype(jnp.bfloat16)                  # (Cout, Ppad)
    widt = wid.T.astype(jnp.float32)                                   # (Cout, Cin) f32

    st1 = jnp.stack([s1, t1], axis=1)                                  # (Cin, 2)
    b12 = (jnp.zeros((Ppad, 2), jnp.float32)
           .at[:P, 0].set(b1f).at[:P, 1].set(b2f))                     # (Ppad, 2)
    bout = (b3 + bid).reshape(Cout, 1)                                 # (Cout, 1)

    # Tiny (9, L) boundary mask (trace-time constant), tiled over B_TILE images.
    hh = np.arange(H).repeat(W)
    ww = np.tile(np.arange(W), H)
    rows = []
    for oy in (-1, 0, 1):
        for ox in (-1, 0, 1):
            rows.append(((hh + oy >= 0) & (hh + oy < H) &
                         (ww + ox >= 0) & (ww + ox < W)).astype(np.float32))
    mask = jnp.asarray(np.tile(np.stack(rows, axis=0), (1, B_TILE)))   # (9, L)

    kernel = functools.partial(_bottleneck_kernel, width=W, hw_block=L)
    full = lambda a: pl.BlockSpec(a.shape, lambda n: (0, 0))

    out2d = pl.pallas_call(
        kernel,
        out_shape=jax.ShapeDtypeStruct((Cout, N * HW), jnp.float32),
        grid=(n_steps,),
        in_specs=[pl.BlockSpec((Cin, L), lambda n: (0, n)),
                  full(st1), full(w1t), full(b12), full(w2t), full(mask),
                  full(w3t), full(widt), full(bout)],
        out_specs=pl.BlockSpec((Cout, L), lambda n: (0, n)),
        compiler_params=pltpu.CompilerParams(dimension_semantics=("parallel",)),
    )(x2d, st1, w1t, b12, w2t, mask, w3t, widt, bout)

    # (Cout, N*HW) -> NCHW
    return out2d.reshape(Cout, N, H, W).transpose(1, 0, 2, 3)


def make_params(key, inplanes, planes, expansion, prev_layer_depth):
    """Deterministic synthetic parameters.  Conv weights stored as (Cin, Cout)
    for 1x1 and (9, Cin, Cout) for 3x3; BN folded to scale/shift (eval mode)."""
    Cout = planes * expansion
    ks = jax.random.split(key, 20)
    eps = 1e-5

    def bn(kg, kb, km, kv, C):
        gamma = 1.0 + 0.1 * jax.random.normal(kg, (C,), jnp.float32)
        beta = 0.1 * jax.random.normal(kb, (C,), jnp.float32)
        mean = 0.1 * jax.random.normal(km, (C,), jnp.float32)
        var = jnp.abs(1.0 + 0.1 * jax.random.normal(kv, (C,), jnp.float32))
        scale = gamma * lax.rsqrt(var + eps)
        shift = beta - mean * scale
        return scale, shift

    s1, t1 = bn(ks[0], ks[1], ks[2], ks[3], prev_layer_depth)   # == inplanes
    s2, t2 = bn(ks[4], ks[5], ks[6], ks[7], planes)
    s3, t3 = bn(ks[8], ks[9], ks[10], ks[11], planes)

    w1 = 0.1 * jax.random.normal(ks[12], (inplanes, planes), jnp.float32)
    b1 = 0.1 * jax.random.normal(ks[13], (planes,), jnp.float32)
    w2_hwio = 0.1 * jax.random.normal(ks[14], (3, 3, planes, planes), jnp.float32)
    b2 = 0.1 * jax.random.normal(ks[15], (planes,), jnp.float32)
    w3 = 0.1 * jax.random.normal(ks[16], (planes, Cout), jnp.float32)
    b3 = 0.1 * jax.random.normal(ks[17], (Cout,), jnp.float32)
    wid = 0.1 * jax.random.normal(ks[18], (inplanes, Cout), jnp.float32)
    bid = 0.1 * jax.random.normal(ks[19], (Cout,), jnp.float32)

    w2_kernel = w2_hwio.reshape(9, planes, planes)
    params = (s1, t1, w1, b1, s2, t2, w2_kernel, b2, s3, t3, w3, b3, wid, bid)
    return params, w2_hwio


def ref_forward(x_nchw, params, w2_hwio):
    """Pure-JAX reference (same eval-mode BN semantics, f32 end to end)."""
    s1, t1, w1, b1, s2, t2, _, b2, s3, t3, w3, b3, wid, bid = params
    bnrelu = lambda v, s, t: jnp.maximum(
        v * s[None, :, None, None] + t[None, :, None, None], 0.0)
    conv1x1 = lambda v, w, b: jnp.einsum("nchw,co->nohw", v, w) + b[None, :, None, None]

    y = conv1x1(bnrelu(x_nchw, s1, t1), w1, b1)
    y = bnrelu(y, s2, t2)
    y = lax.conv_general_dilated(
        y, w2_hwio, window_strides=(1, 1), padding=((1, 1), (1, 1)),
        dimension_numbers=("NCHW", "HWIO", "NCHW")) + b2[None, :, None, None]
    y = conv1x1(bnrelu(y, s3, t3), w3, b3)
    ident = conv1x1(x_nchw, wid, bid)
    return y + ident


if __name__ == "__main__":
    # Bottleneck(inplanes=8, planes=4, prev_layer_depth=8, expansion=4,
    #            stride_3x3=1, padding_3x3=1, conv_identity=True,
    #            stride_conv_identity=1, activation_normalization=True)
    inplanes, planes, expansion = 8, 4, 4
    N, H, W = 2, 16, 16

    key = jax.random.PRNGKey(0)
    kx, kp = jax.random.split(key)
    x = jax.random.normal(kx, (N, inplanes, H, W), jnp.float32)
    params, w2_hwio = make_params(kp, inplanes, planes, expansion, inplanes)

    out = bottleneck_forward(x, params, planes=planes, expansion=expansion)
    out = jax.block_until_ready(out)

    ref = ref_forward(x, params, w2_hwio)
    # bf16 MXU operands (f32 accumulation) -> slightly looser tolerance than f32.
    np.testing.assert_allclose(np.asarray(out), np.asarray(ref), rtol=3e-2, atol=3e-2)
    assert out.shape == (N, planes * expansion, H, W)
    print("KERNEL_OK")
</pallas_src>

<mosaic_0001>
module attributes {stable_mosaic.version = 11 : i64} {
  func.func @_bottleneck_kernel(%arg0: i32, %arg1: memref<8x256xf32, #tpu.memory_space<vmem>>, %arg2: memref<8x2xf32, #tpu.memory_space<vmem>>, %arg3: memref<8x8xbf16, #tpu.memory_space<vmem>>, %arg4: memref<8x2xf32, #tpu.memory_space<vmem>>, %arg5: memref<8x72xbf16, #tpu.memory_space<vmem>>, %arg6: memref<9x256xf32, #tpu.memory_space<vmem>>, %arg7: memref<16x8xbf16, #tpu.memory_space<vmem>>, %arg8: memref<16x8xf32, #tpu.memory_space<vmem>>, %arg9: memref<16x1xf32, #tpu.memory_space<vmem>>, %arg10: memref<16x256xf32, #tpu.memory_space<vmem>>) attributes {dimension_semantics = [#tpu.dimension_semantics<parallel>], iteration_bounds = array<i64: 2>, scalar_prefetch = 0 : i64, scratch_operands = 0 : i64, tpu.core_type = #tpu.core_type<tc>, window_params = [{transform_indices = @transform_0, window_bounds = array<i64: 8, 256>}, {pipeline_mode = #tpu.pipeline_mode<synchronous>, transform_indices = @transform_1, window_bounds = array<i64: 8, 2>}, {pipeline_mode = #tpu.pipeline_mode<synchronous>, transform_indices = @transform_2, window_bounds = array<i64: 8, 8>}, {pipeline_mode = #tpu.pipeline_mode<synchronous>, transform_indices = @transform_3, window_bounds = array<i64: 8, 2>}, {pipeline_mode = #tpu.pipeline_mode<synchronous>, transform_indices = @transform_4, window_bounds = array<i64: 8, 72>}, {pipeline_mode = #tpu.pipeline_mode<synchronous>, transform_indices = @transform_5, window_bounds = array<i64: 9, 256>}, {pipeline_mode = #tpu.pipeline_mode<synchronous>, transform_indices = @transform_6, window_bounds = array<i64: 16, 8>}, {pipeline_mode = #tpu.pipeline_mode<synchronous>, transform_indices = @transform_7, window_bounds = array<i64: 16, 8>}, {pipeline_mode = #tpu.pipeline_mode<synchronous>, transform_indices = @transform_8, window_bounds = array<i64: 16, 1>}, {transform_indices = @transform_9, window_bounds = array<i64: 16, 256>}]} {
    %c0 = arith.constant 0 : index
    %c0_0 = arith.constant 0 : index
    %0 = vector.load %arg1[%c0, %c0_0] : memref<8x256xf32, #tpu.memory_space<vmem>>, vector<8x256xf32>
    %c0_1 = arith.constant 0 : index
    %c0_2 = arith.constant 0 : index
    %1 = vector.load %arg2[%c0_1, %c0_2] : memref<8x2xf32, #tpu.memory_space<vmem>>, vector<8x1xf32>
    %2 = vector.broadcast %1 : vector<8x1xf32> to vector<8x256xf32>
    %3 = arith.mulf %0, %2 : vector<8x256xf32>
    %c0_3 = arith.constant 0 : index
    %c1 = arith.constant 1 : index
    %4 = vector.load %arg2[%c0_3, %c1] : memref<8x2xf32, #tpu.memory_space<vmem>>, vector<8x1xf32>
    %5 = vector.broadcast %4 : vector<8x1xf32> to vector<8x256xf32>
    %6 = arith.addf %3, %5 : vector<8x256xf32>
    %cst = arith.constant 0.000000e+00 : f32
    %7 = vector.broadcast %cst : f32 to vector<8x256xf32>
    %8 = arith.maximumf %6, %7 : vector<8x256xf32>
    %c0_4 = arith.constant 0 : index
    %c0_5 = arith.constant 0 : index
    %9 = vector.load %arg3[%c0_4, %c0_5] : memref<8x8xbf16, #tpu.memory_space<vmem>>, vector<8x8xbf16>
    %10 = arith.truncf %8 : vector<8x256xf32> to vector<8x256xbf16>
    %cst_6 = arith.constant dense<0.000000e+00> : vector<8x256xf32>
    %11 = tpu.matmul %9, %10, %cst_6 {dimension_numbers = #tpu.dot_dimension_numbers<[1], [0], [0], [1], [0, 0, 1, 1], [], []>} : vector<8x8xbf16>, vector<8x256xbf16>, vector<8x256xf32> -> vector<8x256xf32>
    %c0_7 = arith.constant 0 : index
    %c0_8 = arith.constant 0 : index
    %12 = vector.load %arg4[%c0_7, %c0_8] : memref<8x2xf32, #tpu.memory_space<vmem>>, vector<8x1xf32>
    %13 = vector.broadcast %12 : vector<8x1xf32> to vector<8x256xf32>
    %14 = arith.addf %11, %13 : vector<8x256xf32>
    %cst_9 = arith.constant 0.000000e+00 : f32
    %15 = vector.broadcast %cst_9 : f32 to vector<8x256xf32>
    %16 = arith.maximumf %14, %15 : vector<8x256xf32>
    %c17_i32 = arith.constant 17 : i32
    %17 = tpu.dynamic_rotate %16 by %c17_i32 dim 1 : vector<8x256xf32>, i32 -> vector<8x256xf32>
    %c0_10 = arith.constant 0 : index
    %c0_11 = arith.constant 0 : index
    %18 = vector.load %arg6[%c0_10, %c0_11] : memref<9x256xf32, #tpu.memory_space<vmem>>, vector<1x256xf32>
    %19 = vector.broadcast %18 : vector<1x256xf32> to vector<8x256xf32>
    %20 = arith.mulf %17, %19 : vector<8x256xf32>
    %c16_i32 = arith.constant 16 : i32
    %21 = tpu.dynamic_rotate %16 by %c16_i32 dim 1 : vector<8x256xf32>, i32 -> vector<8x256xf32>
    %c1_12 = arith.constant 1 : index
    %c0_13 = arith.constant 0 : index
    %22 = vector.load %arg6[%c1_12, %c0_13] : memref<9x256xf32, #tpu.memory_space<vmem>>, vector<1x256xf32>
    %23 = vector.broadcast %22 : vector<1x256xf32> to vector<8x256xf32>
    %24 = arith.mulf %21, %23 : vector<8x256xf32>
    %c15_i32 = arith.constant 15 : i32
    %25 = tpu.dynamic_rotate %16 by %c15_i32 dim 1 : vector<8x256xf32>, i32 -> vector<8x256xf32>
    %c2 = arith.constant 2 : index
    %c0_14 = arith.constant 0 : index
    %26 = vector.load %arg6[%c2, %c0_14] : memref<9x256xf32, #tpu.memory_space<vmem>>, vector<1x256xf32>
    %27 = vector.broadcast %26 : vector<1x256xf32> to vector<8x256xf32>
    %28 = arith.mulf %25, %27 : vector<8x256xf32>
    %c1_i32 = arith.constant 1 : i32
    %29 = tpu.dynamic_rotate %16 by %c1_i32 dim 1 : vector<8x256xf32>, i32 -> vector<8x256xf32>
    %c3 = arith.constant 3 : index
    %c0_15 = arith.constant 0 : index
    %30 = vector.load %arg6[%c3, %c0_15] : memref<9x256xf32, #tpu.memory_space<vmem>>, vector<1x256xf32>
    %31 = vector.broadcast %30 : vector<1x256xf32> to vector<8x256xf32>
    %32 = arith.mulf %29, %31 : vector<8x256xf32>
    %c255_i32 = arith.constant 255 : i32
    %33 = tpu.dynamic_rotate %16 by %c255_i32 dim 1 : vector<8x256xf32>, i32 -> vector<8x256xf32>
    %c5 = arith.constant 5 : index
    %c0_16 = arith.constant 0 : index
    %34 = vector.load %arg6[%c5, %c0_16] : memref<9x256xf32, #tpu.memory_space<vmem>>, vector<1x256xf32>
    %35 = vector.broadcast %34 : vector<1x256xf32> to vector<8x256xf32>
    %36 = arith.mulf %33, %35 : vector<8x256xf32>
    %c241_i32 = arith.constant 241 : i32
    %37 = tpu.dynamic_rotate %16 by %c241_i32 dim 1 : vector<8x256xf32>, i32 -> vector<8x256xf32>
    %c6 = arith.constant 6 : index
    %c0_17 = arith.constant 0 : index
    %38 = vector.load %arg6[%c6, %c0_17] : memref<9x256xf32, #tpu.memory_space<vmem>>, vector<1x256xf32>
    %39 = vector.broadcast %38 : vector<1x256xf32> to vector<8x256xf32>
    %40 = arith.mulf %37, %39 : vector<8x256xf32>
    %c240_i32 = arith.constant 240 : i32
    %41 = tpu.dynamic_rotate %16 by %c240_i32 dim 1 : vector<8x256xf32>, i32 -> vector<8x256xf32>
    %c7 = arith.constant 7 : index
    %c0_18 = arith.constant 0 : index
    %42 = vector.load %arg6[%c7, %c0_18] : memref<9x256xf32, #tpu.memory_space<vmem>>, vector<1x256xf32>
    %43 = vector.broadcast %42 : vector<1x256xf32> to vector<8x256xf32>
    %44 = arith.mulf %41, %43 : vector<8x256xf32>
    %c239_i32 = arith.constant 239 : i32
    %45 = tpu.dynamic_rotate %16 by %c239_i32 dim 1 : vector<8x256xf32>, i32 -> vector<8x256xf32>
    %c8 = arith.constant 8 : index
    %c0_19 = arith.constant 0 : index
    %46 = vector.load %arg6[%c8, %c0_19] : memref<9x256xf32, #tpu.memory_space<vmem>>, vector<1x256xf32>
    %47 = vector.broadcast %46 : vector<1x256xf32> to vector<8x256xf32>
    %48 = arith.mulf %45, %47 : vector<8x256xf32>
    %49 = tpu.concatenate %20, %24, %28, %32, %16, %36, %40, %44, %48 in 0 : vector<8x256xf32>, vector<8x256xf32>, vector<8x256xf32>, vector<8x256xf32>, vector<8x256xf32>, vector<8x256xf32>, vector<8x256xf32>, vector<8x256xf32>, vector<8x256xf32> -> vector<72x256xf32>
    %50 = arith.truncf %49 : vector<72x256xf32> to vector<72x256xbf16>
    %c0_20 = arith.constant 0 : index
    %c0_21 = arith.constant 0 : index
    %51 = vector.load %arg5[%c0_20, %c0_21] : memref<8x72xbf16, #tpu.memory_space<vmem>>, vector<8x72xbf16>
    %cst_22 = arith.constant dense<0.000000e+00> : vector<8x256xf32>
    %52 = tpu.matmul %51, %50, %cst_22 {dimension_numbers = #tpu.dot_dimension_numbers<[1], [0], [0], [1], [0, 0, 1, 1], [], []>} : vector<8x72xbf16>, vector<72x256xbf16>, vector<8x256xf32> -> vector<8x256xf32>
    %c0_23 = arith.constant 0 : index
    %c1_24 = arith.constant 1 : index
    %53 = vector.load %arg4[%c0_23, %c1_24] : memref<8x2xf32, #tpu.memory_space<vmem>>, vector<8x1xf32>
    %54 = vector.broadcast %53 : vector<8x1xf32> to vector<8x256xf32>
    %55 = arith.addf %52, %54 : vector<8x256xf32>
    %cst_25 = arith.constant 0.000000e+00 : f32
    %56 = vector.broadcast %cst_25 : f32 to vector<8x256xf32>
    %57 = arith.maximumf %55, %56 : vector<8x256xf32>
    %c0_26 = arith.constant 0 : index
    %c0_27 = arith.constant 0 : index
    %58 = vector.load %arg7[%c0_26, %c0_27] : memref<16x8xbf16, #tpu.memory_space<vmem>>, vector<16x8xbf16>
    %59 = arith.truncf %57 : vector<8x256xf32> to vector<8x256xbf16>
    %cst_28 = arith.constant dense<0.000000e+00> : vector<16x256xf32>
    %60 = tpu.matmul %58, %59, %cst_28 {dimension_numbers = #tpu.dot_dimension_numbers<[1], [0], [0], [1], [0, 0, 1, 1], [], []>} : vector<16x8xbf16>, vector<8x256xbf16>, vector<16x256xf32> -> vector<16x256xf32>
    %c0_29 = arith.constant 0 : index
    %c0_30 = arith.constant 0 : index
    %61 = vector.load %arg8[%c0_29, %c0_30] : memref<16x8xf32, #tpu.memory_space<vmem>>, vector<16x8xf32>
    %cst_31 = arith.constant dense<0.000000e+00> : vector<16x256xf32>
    %62 = tpu.matmul %61, %0, %cst_31 {dimension_numbers = #tpu.dot_dimension_numbers<[1], [0], [0], [1], [0, 0, 1, 1], [], []>} : vector<16x8xf32>, vector<8x256xf32>, vector<16x256xf32> -> vector<16x256xf32>
    %63 = arith.addf %60, %62 : vector<16x256xf32>
    %c0_32 = arith.constant 0 : index
    %c0_33 = arith.constant 0 : index
    %64 = vector.load %arg9[%c0_32, %c0_33] : memref<16x1xf32, #tpu.memory_space<vmem>>, vector<16x1xf32>
    %65 = vector.broadcast %64 : vector<16x1xf32> to vector<16x256xf32>
    %66 = arith.addf %63, %65 : vector<16x256xf32>
    %c0_34 = arith.constant 0 : index
    %c0_35 = arith.constant 0 : index
    %67 = vector.load %arg10[%c0_34, %c0_35] : memref<16x256xf32, #tpu.memory_space<vmem>>, vector<16x256xf32>
    tpu.vector_store %arg10[%c0_34, %c0_35], %66 {strides = array<i32>} : memref<16x256xf32, #tpu.memory_space<vmem>>, vector<16x256xf32>,
    return
  }
  func.func @transform_0(%arg0: i32) -> (i32, i32) {
    %c0_i32 = arith.constant 0 : i32
    %c0_i32_0 = arith.constant 0 : i32
    return %c0_i32, %arg0 : i32, i32
  }
  func.func @transform_1(%arg0: i32) -> (i32, i32) {
    %c0_i32 = arith.constant 0 : i32
    %c0_i32_0 = arith.constant 0 : i32
    %c0_i32_1 = arith.constant 0 : i32
    return %c0_i32, %c0_i32_0 : i32, i32
  }
  func.func @transform_2(%arg0: i32) -> (i32, i32) {
    %c0_i32 = arith.constant 0 : i32
    %c0_i32_0 = arith.constant 0 : i32
    %c0_i32_1 = arith.constant 0 : i32
    return %c0_i32, %c0_i32_0 : i32, i32
  }
  func.func @transform_3(%arg0: i32) -> (i32, i32) {
    %c0_i32 = arith.constant 0 : i32
    %c0_i32_0 = arith.constant 0 : i32
    %c0_i32_1 = arith.constant 0 : i32
    return %c0_i32, %c0_i32_0 : i32, i32
  }
  func.func @transform_4(%arg0: i32) -> (i32, i32) {
    %c0_i32 = arith.constant 0 : i32
    %c0_i32_0 = arith.constant 0 : i32
    %c0_i32_1 = arith.constant 0 : i32
    return %c0_i32, %c0_i32_0 : i32, i32
  }
  func.func @transform_5(%arg0: i32) -> (i32, i32) {
    %c0_i32 = arith.constant 0 : i32
    %c0_i32_0 = arith.constant 0 : i32
    %c0_i32_1 = arith.constant 0 : i32
    return %c0_i32, %c0_i32_0 : i32, i32
  }
  func.func @transform_6(%arg0: i32) -> (i32, i32) {
    %c0_i32 = arith.constant 0 : i32
    %c0_i32_0 = arith.constant 0 : i32
    %c0_i32_1 = arith.constant 0 : i32
    return %c0_i32, %c0_i32_0 : i32, i32
  }
  func.func @transform_7(%arg0: i32) -> (i32, i32) {
    %c0_i32 = arith.constant 0 : i32
    %c0_i32_0 = arith.constant 0 : i32
    %c0_i32_1 = arith.constant 0 : i32
    return %c0_i32, %c0_i32_0 : i32, i32
  }
  func.func @transform_8(%arg0: i32) -> (i32, i32) {
    %c0_i32 = arith.constant 0 : i32
    %c0_i32_0 = arith.constant 0 : i32
    %c0_i32_1 = arith.constant 0 : i32
    return %c0_i32, %c0_i32_0 : i32, i32
  }
  func.func @transform_9(%arg0: i32) -> (i32, i32) {
    %c0_i32 = arith.constant 0 : i32
    %c0_i32_0 = arith.constant 0 : i32
    return %c0_i32, %arg0 : i32, i32
  }
}

</mosaic_0001>

<bundles_post_ra>
// kernel: bottleneck_forward.1
= control target key start
LH: loop header
LB: loop body
LE: loop exit
PB: predicated region body
PF: predicated region fallthrough
CT: control target
= control target key end

     0   :  { %s1061_s30 = smov 0   ;;  %s1063_s10 = smov 0   ;;  %s1230_s0 = inlined_call_operand.vmem [shape: f32[8,512], index: 0, kind: input, shape index: {}]   ;;  %s1231_s1 = inlined_call_operand.vmem [shape: f32[8,2], index: 1, kind: input, shape index: {}]   ;;  %s1232_s2 = inlined_call_operand.vmem [shape: bf16[8,8], index: 2, kind: input, shape index: {}]   ;;  %s1233_s3 = inlined_call_operand.vmem [shape: f32[8,2], index: 3, kind: input, shape index: {}]   ;;  %s1234_s4 = inlined_call_operand.vmem [shape: bf16[8,72], index: 4, kind: input, shape index: {}]   ;;  %s1235_s5 = inlined_call_operand.vmem [shape: f32[9,256], index: 5, kind: input, shape index: {}]   ;;  %s1236_s6 = inlined_call_operand.vmem [shape: bf16[16,8], index: 6, kind: input, shape index: {}]   ;;  %s1237_s7 = inlined_call_operand.vmem [shape: f32[16,8], index: 7, kind: input, shape index: {}]   ;;  %s1238_s8 = inlined_call_operand.vmem [shape: f32[16,1], index: 8, kind: input, shape index: {}]   ;;  %s1239_s9 = inlined_call_operand.vmem [shape: f32[16,512], index: 9, kind: output, shape index: {}]  }
   0x1   :  { %s1065_s11 = smov 0  }
   0x2 LB: > { %s1074_s12 = sadd.s32 4294967295, %s998_s11   ;;  %s1076_s13 = sadd.s32 1, %s998_s11   ;;  %s998_s11 = sphi %s1065_s11, %s1243_s11   ;;  %s994_s10 = sphi %s1063_s10, %s1242_s10   ;;  %s990_s30 = sphi %s1061_s30, %s1241_s30  }
   0x3   : > { %s217_s14 = ssub.s32 %s998_s11, %s1076_s13  ;;  %s220_s15 = sadd.s32 1, %s994_s10 }
   0x4   : > { %p218_p0 = scmp.eq.s32.totalorder %s217_s14, 0  ;;  %p230_p1 = scmp.ne.s32.totalorder %s994_s10, %s990_s30 }
   0x5   : > { %p231_p2 = scmp.eq.s32.totalorder %s1074_s12, 1  ;;  %p910_p3 = scmp.ge.s32.totalorder %s998_s11, 1 }
   0x6   : > { %s1084_s16 = scalar_select %p218_p0, %s994_s10, %s220_s15  }
   0x7   : > { %p1086_p4 = por %p231_p2, %p230_p1  ;;  %p288_p5 = scmp.lt.s32.totalorder %s998_s11, 3 }
   0x9   : > { %p289_p6 = pnand %p910_p3, %p288_p5 }
   0xa   : > { %v333_v0 = vld [vmem:[%s1231_s1] sm:$0xff] (!%p289_p6)  ;;  %v1000_v1 = vmov (!%p289_p6), 0   ;;  %v1001_v2 = vmov (!%p289_p6), 1   ;;  %s912_s22 = sshll.u32 (!%p289_p6), %s1074_s12, 1  ;;  %vm362_vm0 = vcmask (!%p289_p6), 1043456   ;;  %vm358_vm1 = vcmask (!%p289_p6), 64512  }
   0xb   : > { %292 = sbr.rel (%p289_p6) target bundleno = 978 (0x3d2), region = 56  ;;  %971 = vset.pattern.permute.xlu0 (!%p289_p6), %v1000_v1  ;;  %401 = vmatprep.mubr.bf16.mxu0 (!%p289_p6), %v1000_v1  ;;  %v352_v3 = vld [vmem:[%s1233_s3] sm:$0xff] (!%p289_p6)  ;;  %p324_p7 = scmp.lt.s32.totalorder (!%p289_p6), %s912_s22, 3  ;;  %v416_v28 = vlaneseq (!%p289_p6)  ;;  %vm604_vm10 = vcmask (!%p289_p6), 588800  }
   0xc   : > { %336 = vperm.xlu0 (!%p289_p6), %971, %v333_v0   ;;  %973 = vset.pattern.permute.xlu1 (!%p289_p6), %v1000_v1  ;;  %v349_v17 = vld [vmem:[%s1232_s2] sm:$0xf] (!%p289_p6)  ;;  %s1002_s29 = smov (!%p289_p6), 16   ;;  %s1003_s11 = smov (!%p289_p6), 17  }
   0xd   : > { %646 = vmatprep.mubr.bf16.mxu1 (!%p289_p6), %v1000_v1  ;;  %355 = vperm.xlu1 (!%p289_p6), %973, %v352_v3   ;;  %s1004_s14 = smov (!%p289_p6), 15   ;;  %s1005_s15 = smov (!%p289_p6), 1   ;;  %v803_v27 = vld [vmem:[%s1238_s8] sm:$0xff] (!%p289_p6)  ;;  %v424_v29 = vshrl.u32 (!%p289_p6), %v416_v28, 7  ;;  %v1134_v32 = vand.u32 (!%p289_p6), 127, %v416_v28 }
   0xe   : > { %s1006_s18 = smov (!%p289_p6), 127   ;;  %s1007_s19 = smov (!%p289_p6), 113   ;;  %v421_v34 = vld [vmem:[%s1235_s5] ss:$8 sm:$0x3] (!%p289_p6) }
   0xf   : > { %s1008_s20 = smov (!%p289_p6), 112   ;;  %s1009_s21 = smov (!%p289_p6), 111   ;;  %v1136_v33 = vsub.s32 (!%p289_p6), 0, %v424_v29  ;;  %v1141_v35 = vsub.s32 (!%p289_p6), 1, %v424_v29  ;;  %vm418_vm2 = vcmp.lt.s32.totalorder (!%p289_p6), %v1134_v32, 17  ;;  %vm439_vm3 = vcmp.lt.s32.totalorder (!%p289_p6), %v1134_v32, 16 }
  0x10   : > { %972 = vset.pattern.permute.xlu0 (!%p289_p6), %v1001_v2  ;;  %v916_v36 = vld [vmem:[%s1235_s5 + $0x1] ss:$8 sm:$0x3] (!%p289_p6)  ;;  %v917_v51 = vld [vmem:[%s1235_s5 + $0x2] ss:$8 sm:$0x3] (!%p289_p6) }
  0x11   : > { %342 = vperm.xlu0 (!%p289_p6), %972, %v333_v0   ;;  %v426_v39 = vrot.slane (!%p289_p6), %v421_v34, %v1136_v33  ;;  %v448_v40 = vrot.slane (!%p289_p6), %v916_v36, %v1136_v33  ;;  %v430_v41 = vrot.slane (!%p289_p6), %v421_v34, %v1141_v35  ;;  %v452_v42 = vrot.slane (!%p289_p6), %v916_v36, %v1141_v35  ;;  %v918_v54 = vld [vmem:[%s1235_s5 + $0x3] ss:$8 sm:$0x3] (!%p289_p6)  ;;  %v919_v63 = vld [vmem:[%s1235_s5 + $0x5] ss:$8 sm:$0x3] (!%p289_p6) }
  0x12   : > { %s1245_s22 = smov (!%p324_p7, %s912_s22), 3  ;;  %vm461_vm4 = vcmp.lt.s32.totalorder %v1134_v32, 15  ;;  %v470_v58 = vrot.slane %v917_v51, %v1136_v33  ;;  %v474_v60 = vrot.slane %v917_v51, %v1141_v35  ;;  %vm483_vm5 = vcmp.lt.s32.totalorder %v1134_v32, 1  ;;  %v922_v34 = vld [vmem:[%s1235_s5 + $0x10] ss:$8 sm:$0x3] }
  0x13   : > { %s913_s23 = sshll.u32 %s1245_s22, 3  ;;  %v492_v61 = vrot.slane %v918_v54, %v1136_v33  ;;  %v496_v62 = vrot.slane %v918_v54, %v1141_v35  ;;  %vm505_vm6 = vcmp.lt.s32.totalorder %v1134_v32, 127  ;;  %vm527_vm7 = vcmp.lt.s32.totalorder %v1134_v32, 113 }
  0x14   : > { %s327_s26 = scalar_lea.vmem %s1230_s0, %s913_s23  ;;  %vm549_vm8 = vcmp.lt.s32.totalorder %v1134_v32, 112  ;;  %vm571_vm9 = vcmp.lt.s32.totalorder %v1134_v32, 111  ;;  %v1010_v54 = vmov 0.0  }
  0x15   : > { %v331_v5 = vld [vmem:[%s327_s26] sm:$0xff]  ;;  %v332_v6 = vld [vmem:[%s327_s26 + $0x8] sm:$0xff] }
  0x8b   : > { %v337_v4 = vpop.permute.xlu0 %336 }
  0x8c   : > { %v339_v7 = vmul.f32 %v337_v4, %v331_v5  ;;  %v340_v8 = vmul.f32 %v337_v4, %v332_v6  ;;  %v356_v18 = vpop.permute.xlu1 %355 }
  0x90   : > { %v343_v9 = vpop.permute.xlu0 %342 }
  0x91   : > { %v345_v10 = vadd.f32 %v343_v9, %v339_v7  ;;  %v346_v11 = vadd.f32 %v343_v9, %v340_v8  ;;  %v518_v7 = vrot.slane %v919_v63, %v1141_v35 }
  0x93   : > { %v347_v12 = vmax.f32 %v345_v10, 0.0  ;;  %v348_v13 = vmax.f32 %v346_v11, 0.0 }
  0x95   : > { %v351_v14 = vpack.c.bf16 %v348_v13, %v348_v13  ;;  %v350_v15 = vpack.c.bf16 %v347_v12, %v347_v12 }
  0x97   : > { %914 = vmatprep.subr.msk.bf16.mxu0 %vm362_vm0, %v351_v14  ;;  %v364_v16 = vsel %vm362_vm0, %v350_v15, 0 }
  0x98   : > { %370 = vmatpush1.bf16.msra.mxu0 %v364_v16 }
  0x99   : > { %669 = vmatprep.subr.mxu0 %v332_v6  ;;  %v514_v6 = vrot.slane %v919_v63, %v1136_v33 }
  0x9b   : > { %915 = vmatmul.mubr.msk.bf16.vlgmr.msra.gmra.mrb[0].mxu0 %vm358_vm1, %v349_v17 }
  0x9c   : > { %670 = vmatpush1.msra.mxu0 %v331_v5  ;;  %733 = vmatprep.mubr.f32.mxu0 %v1010_v54 }
 0x16e   : > { %v403_v19 = vpop.f32.mrb[0].mxu0 }
 0x16f   : > { %v404_v20 = vadd.f32 %v403_v19, %v356_v18  ;;  %v405_v21 = vpop.f32.mrb[1].mxu0 }
 0x170   : > { %v407_v22 = vpop.f32.mrb[2].mxu0  ;;  %v406_v24 = vadd.f32 %v405_v21, %v356_v18  ;;  %v921_v21 = vld [vmem:[%s1235_s5 + $0x7] ss:$8 sm:$0x3] }
 0x171   : > { %v1110_v23 = vmax.f32 %v404_v20, 0.0  ;;  %v408_v25 = vpop.f32.mrb[3].mxu0  ;;  %v920_v20 = vld [vmem:[%s1235_s5 + $0x6] ss:$8 sm:$0x3] }
 0x172   : > { %v1114_v26 = vmax.f32 %v406_v24, 0.0  ;;  %v540_v29 = vrot.slane %v920_v20, %v1141_v35 }
 0x173   : > { %435 = vrot.lane.b32.xlu0 %v1110_v23, %s1002_s29  ;;  %412 = vrot.lane.b32.xlu1 %v1110_v23, %s1003_s11 }
 0x177   : > { %457 = vrot.lane.b32.xlu0 %v1110_v23, %s1004_s14  ;;  %414 = vrot.lane.b32.xlu1 %v1114_v26, %s1003_s11 }
 0x17b   : > { %479 = vrot.lane.b32.xlu0 %v1110_v23, %s1005_s15  ;;  %437 = vrot.lane.b32.xlu1 %v1114_v26, %s1002_s29 }
 0x17f   : > { %501 = vrot.lane.b32.xlu0 %v1110_v23, %s1006_s18  ;;  %459 = vrot.lane.b32.xlu1 %v1114_v26, %s1004_s14 }
 0x183   : > { %523 = vrot.lane.b32.xlu0 %v1110_v23, %s1007_s19  ;;  %481 = vrot.lane.b32.xlu1 %v1114_v26, %s1005_s15 }
 0x187   : > { %545 = vrot.lane.b32.xlu0 %v1110_v23, %s1008_s20  ;;  %503 = vrot.lane.b32.xlu1 %v1114_v26, %s1006_s18 }
 0x18b   : > { %567 = vrot.lane.b32.xlu0 %v1110_v23, %s1009_s21  ;;  %525 = vrot.lane.b32.xlu1 %v1114_v26, %s1007_s19 }
 0x18f   : > { %601 = vperm.xlu0 %972, %v352_v3   ;;  %547 = vrot.lane.b32.xlu1 %v1114_v26, %s1008_s20  ;;  %s320_s20 = sand.u32 1, %s990_s30   ;;  %s935_s30 = sshll.u32 (%p1086_p4), %s1074_s12, 4 }
 0x190   : > { %s832_s25 = scalar_lea.vmem (%p1086_p4), %s1239_s9, %s935_s30 }
 0x193   : > { %569 = vrot.lane.b32.xlu1 %v1114_v26, %s1009_s21  ;;  %974 = vset.pattern.permute.xlu0 %v1000_v1  ;;  %s911_s21 = sshll.u32 %s320_s20, 5 }
 0x194   : > { %s322_s22 = scalar_lea.vmem [#allocation2], %s911_s21 }
 0x197   : > { %807 = vperm.xlu1 %973, %v803_v27   ;;  %v536_v27 = vrot.slane %v920_v20, %v1136_v33 }
 0x1e5   : > { %v436_v30 = vpop.permute.xlu0 %435  ;;  %v413_v31 = vpop.permute.xlu1 %412 }
 0x1e9   : > { %v458_v37 = vpop.permute.xlu0 %457  ;;  %v415_v38 = vpop.permute.xlu1 %414 }
 0x1ea   : > { %v419_v43 = vsel %vm418_vm2, %v413_v31, %v415_v38  ;;  %v420_v44 = vsel %vm418_vm2, %v415_v38, %v413_v31  ;;  %v562_v31 = vrot.slane %v921_v21, %v1141_v35 }
 0x1eb   : > { %v433_v49 = vmul.f32 %v426_v39, %v420_v44  ;;  %v434_v52 = vmul.f32 %v430_v41, %v419_v43  ;;  %v580_v39 = vrot.slane %v922_v34, %v1136_v33 }
 0x1ed   : > { %v480_v45 = vpop.permute.xlu0 %479  ;;  %v438_v46 = vpop.permute.xlu1 %437 }
 0x1ee   : > { %v440_v47 = vsel %vm439_vm3, %v436_v30, %v438_v46  ;;  %v441_v48 = vsel %vm439_vm3, %v438_v46, %v436_v30  ;;  %v558_v30 = vrot.slane %v921_v21, %v1136_v33 }
 0x1ef   : > { %v455_v50 = vmul.f32 %v448_v40, %v441_v48  ;;  %v456_v53 = vmul.f32 %v452_v42, %v440_v47  ;;  %v584_v40 = vrot.slane %v922_v34, %v1141_v35  ;;  %v599_v35 = vld [vmem:[%s1234_s4] sm:$0xf] }
 0x1f1   : > { %v460_v55 = vpop.permute.xlu1 %459  ;;  %v590_v56 = vpack.c.bf16 %v456_v53, %v434_v52  ;;  %v589_v57 = vpack.c.bf16 %v455_v50, %v433_v49  ;;  %v502_v59 = vpop.permute.xlu0 %501 }
 0x1f2   : > { %v462_v0 = vsel %vm461_vm4, %v458_v37, %v460_v55  ;;  %v463_v2 = vsel %vm461_vm4, %v460_v55, %v458_v37  ;;  %v661_v55 = vld [vmem:[%s1237_s7] sm:$0xff] }
 0x1f3   : > { %614 = vmatprep.subr.bf16.mxu1 %v590_v56  ;;  %v477_v8 = vmul.f32 %v470_v58, %v463_v2  ;;  %v478_v9 = vmul.f32 %v474_v60, %v462_v0  ;;  %925 = vmatmul.mubr.msk.f32.vlgmr.msra.gmra.mrb[4].mxu0 %vm358_vm1, %v661_v55  ;;  %v662_v56 = vld [vmem:[%s1237_s7 + $0x8] sm:$0xff] }
 0x1f4   : > { %615 = vmatpush1.bf16.msra.mxu1 %v589_v57  ;;  %739 = vmatprep.mubr.f32.mxu0 %v1010_v54  ;;  %v804_v57 = vld [vmem:[%s1238_s8 + $0x8] sm:$0xff] }
 0x1f5   : > { %v482_v3 = vpop.permute.xlu1 %481  ;;  %v524_v12 = vpop.permute.xlu0 %523  ;;  %812 = vperm.xlu0 %974, %v804_v57  }
 0x1f6   : > { %v484_v4 = vsel %vm483_vm5, %v480_v45, %v482_v3  ;;  %v485_v5 = vsel %vm483_vm5, %v482_v3, %v480_v45 }
 0x1f7   : > { %v499_v10 = vmul.f32 %v492_v61, %v485_v5  ;;  %v500_v11 = vmul.f32 %v496_v62, %v484_v4  ;;  %926 = vmatmul.mubr.msk.f32.gmra.mrb[6].mxu0 %vm358_vm1, %v662_v56 }
 0x1f8   : > { %792 = vmatprep.mubr.bf16.mxu0 %v1000_v1  ;;  %v975_v1 = vld [vmem:[%s1236_s6] sm:$0xff]  }
 0x1f9   : > { %v504_v13 = vpop.permute.xlu1 %503  ;;  %v592_v14 = vpack.c.bf16 %v500_v11, %v478_v9  ;;  %v591_v15 = vpack.c.bf16 %v499_v10, %v477_v8  ;;  %v546_v28 = vpop.permute.xlu0 %545 }
 0x1fa   : > { %v506_v16 = vsel %vm505_vm6, %v502_v59, %v504_v13  ;;  %v507_v17 = vsel %vm505_vm6, %v504_v13, %v502_v59 }
 0x1fb   : > { %v521_v18 = vmul.f32 %v514_v6, %v506_v16  ;;  %v522_v19 = vmul.f32 %v518_v7, %v507_v17  ;;  %616 = vmatprep.subr.bf16.mxu1 %v592_v14 }
 0x1fc   : > { %617 = vmatpush1.bf16.msra.mxu1 %v591_v15 }
 0x1fd   : > { %v526_v22 = vpop.permute.xlu1 %525  ;;  %v594_v24 = vpack.c.bf16 %v522_v19, %v1114_v26  ;;  %v593_v25 = vpack.c.bf16 %v521_v18, %v1110_v23  ;;  %v568_v45 = vpop.permute.xlu0 %567 }
 0x1fe   : > { %v528_v36 = vsel %vm527_vm7, %v524_v12, %v526_v22  ;;  %v529_v26 = vsel %vm527_vm7, %v526_v22, %v524_v12 }
 0x1ff   : > { %618 = vmatprep.subr.bf16.mxu1 %v594_v24  ;;  %v543_v41 = vmul.f32 %v536_v27, %v528_v36  ;;  %v544_v42 = vmul.f32 %v540_v29, %v529_v26 }
 0x200   : > { %619 = vmatpush1.bf16.msra.mxu1 %v593_v25 }
 0x201   : > { %v548_v23 = vpop.permute.xlu1 %547 }
 0x202   : > { %v550_v37 = vsel %vm549_vm8, %v546_v28, %v548_v23  ;;  %v551_v38 = vsel %vm549_vm8, %v548_v23, %v546_v28 }
 0x203   : > { %v565_v43 = vmul.f32 %v558_v30, %v550_v37  ;;  %v566_v44 = vmul.f32 %v562_v31, %v551_v38 }
 0x205   : > { %v570_v46 = vpop.permute.xlu1 %569  ;;  %v596_v47 = vpack.c.bf16 %v566_v44, %v544_v42  ;;  %v595_v48 = vpack.c.bf16 %v565_v43, %v543_v41 }
 0x206   : > { %v572_v49 = vsel %vm571_vm9, %v568_v45, %v570_v46  ;;  %v573_v50 = vsel %vm571_vm9, %v570_v46, %v568_v45 }
 0x207   : > { %v587_v51 = vmul.f32 %v580_v39, %v572_v49  ;;  %v588_v52 = vmul.f32 %v584_v40, %v573_v50  ;;  %620 = vmatprep.subr.bf16.mxu1 %v596_v47 }
 0x208   : > { %621 = vmatpush1.bf16.msra.mxu1 %v595_v48 }
 0x209   : > { %v597_v32 = vpack.c.bf16 %v587_v51, %v587_v51  ;;  %v598_v53 = vpack.c.bf16 %v588_v52, %v588_v52 }
 0x20b   : > { %923 = vmatprep.subr.msk.bf16.mxu1 %vm362_vm0, %v598_v53  ;;  %v609_v33 = vsel %vm362_vm0, %v597_v32, 0 }
 0x20c   : > { %623 = vmatpush1.bf16.msra.mxu1 %v609_v33 }
 0x20e   : > { %v602_v58 = vpop.permute.xlu0 %601 }
 0x20f   : > { %924 = vmatmul.mubr.msk.bf16.vlgmr.msra.gmra.mrb[0].mxu1 %vm604_vm10, %v599_v35 }
 0x216   : > { %v808_v12 = vpop.permute.xlu1 %807 }
 0x274   : > { %v813_v17 = vpop.permute.xlu0 %812 }
 0x2c6   : > { %v735_v7 = vpop.f32.mrb[4].mxu0 }
 0x2c7   : > { %v737_v8 = vpop.f32.mrb[5].mxu0 }
 0x2ca   : > { %v741_v9 = vpop.f32.mrb[6].mxu0 }
 0x2cb   : > { %v743_v10 = vpop.f32.mrb[7].mxu0 }
 0x2e2   : > { %v648_v59 = vpop.f32.mrb[0].mxu1 }
 0x2e3   : > { %v649_v60 = vadd.f32 %v648_v59, %v602_v58  ;;  %v650_v61 = vpop.f32.mrb[1].mxu1 }
 0x2e4   : > { %v651_v62 = vadd.f32 %v650_v61, %v602_v58  ;;  %v652_v63 = vpop.f32.mrb[2].mxu1 }
 0x2e5   : > { %v655_v0 = vmax.f32 %v649_v60, 0.0  ;;  %v653_v2 = vpop.f32.mrb[3].mxu1 }
 0x2e6   : > { %v656_v3 = vmax.f32 %v651_v62, 0.0 }
 0x2e7   : > { %v659_v4 = vpack.c.bf16 %v655_v0, %v655_v0 }
 0x2e8   : > { %v660_v5 = vpack.c.bf16 %v656_v3, %v656_v3 }
 0x2e9   : > { %v755_v6 = vsel %vm362_vm0, %v659_v4, 0 }
 0x2ea   : > { %928 = vmatprep.subr.msk.bf16.mxu0 %vm362_vm0, %v660_v5 }
 0x2eb   : > { %761 = vmatpush1.bf16.msra.mxu0 %v755_v6 }
 0x2ee   : > { %929 = vmatmul.mubr.msk.bf16.vlgmr.msra.gmra.mrb[8].mxu0 %vm358_vm1, %v975_v1 }
 0x3c1   : > { %v794_v11 = vpop.f32.mrb[8].mxu0 }
 0x3c2   : > { %v795_v13 = vadd.f32 %v794_v11, %v735_v7  ;;  %v796_v14 = vpop.f32.mrb[9].mxu0 }
 0x3c3   : > { %v797_v15 = vadd.f32 %v796_v14, %v737_v8  ;;  %v798_v16 = vpop.f32.mrb[10].mxu0  ;;  %829 = sbr.rel (!%p1086_p4) target bundleno = 978 (0x3d2), region = 60 }
 0x3c4   : > { %v815_v18 = vadd.f32 %v808_v12, %v795_v13  ;;  %v799_v19 = vadd.f32 %v798_v16, %v741_v9  ;;  %v800_v20 = vpop.f32.mrb[11].mxu0 }
 0x3c5   : > { %v816_v21 = vadd.f32 %v808_v12, %v797_v15  ;;  %v801_v22 = vadd.f32 %v800_v20, %v743_v10 }
 0x3c6   : > { %819 = vst [vmem:[%s322_s22] sm:$0xff] %v815_v18  ;;  %v817_v24 = vadd.f32 %v813_v17, %v799_v19 }
 0x3c7   : > { %820 = vst [vmem:[%s322_s22 + $0x8] sm:$0xff] %v816_v21  ;;  %v818_v25 = vadd.f32 %v813_v17, %v801_v22 }
 0x3c8   : > { %821 = vst [vmem:[%s322_s22 + $0x10] sm:$0xff] %v817_v24 }
 0x3c9   : > { %822 = vst [vmem:[%s322_s22 + $0x18] sm:$0xff] %v818_v25 }
 0x3cd   : > { %v845_v27 = vld [vmem:[%s322_s22] sm:$0xff] }
 0x3ce   : > { %v847_v28 = vld [vmem:[%s322_s22 + $0x8] sm:$0xff]  ;;  %846 = vst [vmem:[%s832_s25] sm:$0xff] %v845_v27 }
 0x3cf   : > { %v849_v29 = vld [vmem:[%s322_s22 + $0x10] sm:$0xff]  ;;  %848 = vst [vmem:[%s832_s25 + $0x8] sm:$0xff] %v847_v28 }
 0x3d0   : > { %v851_v30 = vld [vmem:[%s322_s22 + $0x18] sm:$0xff]  ;;  %850 = vst [vmem:[%s832_s25 + $0x20] sm:$0xff] %v849_v29 }
 0x3d1   : > { %852 = vst [vmem:[%s832_s25 + $0x28] sm:$0xff] %v851_v30 }
 0x3d2 PF: > { %p16_p8 = scmp.ge.s32.totalorder %s1076_s13, 4   ;;  %s1241_s30 = smov %s994_s10 }
 0x3d3   : > { %s1242_s10 = smov %s1084_s16  ;;  %s1243_s11 = smov %s1076_s13 }
 0x3d4   :  { %18 = sbr.rel (!%p16_p8) target bundleno = 2 (0x2), region = 116 }

</bundles_post_ra>
